<compile_context>
chip_gen: v5e
topology: v5e:2x2
jax: 0.10.0
libtpu: 0.0.40
codegen_flags: <defaults>
</compile_context>

<pallas_src>
import functools

import jax
import jax.numpy as jnp
from jax.experimental import pallas as pl
from jax.experimental.pallas import tpu as pltpu


LANE = 128


def _round_up(d: int, m: int = LANE) -> int:
    return ((d + m - 1) // m) * m


def _fused_mlp_kernel(*refs, num_layers, use_bn, use_relu, eps):
    """Entire FC stack in one kernel invocation; activations stay on-chip.

    refs = (x_ref,
            w0, vec0, w1, vec1, ...,   # per-layer: bf16 weight, (3,D) f32 [b;gamma;beta]
            o_ref)
    """
    x_ref = refs[0]
    layer_refs = refs[1:1 + 2 * num_layers]
    o_ref = refs[1 + 2 * num_layers]

    inv_b = 1.0 / x_ref.shape[0]
    act = x_ref[...].astype(jnp.bfloat16)          # (B, Din_pad) bf16 into MXU

    for li in range(num_layers):
        w = layer_refs[2 * li][...]                # (Din_pad, Dout_pad) bf16
        vec = layer_refs[2 * li + 1][...]          # (3, Dout_pad) f32: bias/gamma/beta

        # bf16 operands into the MXU, f32 accumulation; epilogue stays f32
        # (v5e VPU/EUP have no bf16).
        y = jnp.dot(act, w, preferred_element_type=jnp.float32)

        if use_bn[li]:
            # Linear bias cancels under BatchNorm -> skip the add entirely.
            # Two-pass (mean, then centered sumsq) for numerical robustness.
            mean = jnp.sum(y, axis=0, keepdims=True) * inv_b
            c = y - mean
            var = jnp.sum(c * c, axis=0, keepdims=True) * inv_b
            gamma = vec[1:2, :]
            beta = vec[2:3, :]
            y = c * (jax.lax.rsqrt(var + eps) * gamma) + beta
        else:
            y = y + vec[0:1, :]                    # bias

        if use_relu[li]:
            y = jnp.maximum(y, 0.0)

        if li < num_layers - 1:
            # Keep the intermediate activation in registers; cast once for the
            # next layer's MXU feed.
            act = y.astype(jnp.bfloat16)
        else:
            o_ref[...] = y.astype(o_ref.dtype)


def _parse_acts(layer_acts):
    use_relu = []
    for act in layer_acts:
        a = act.upper()
        if a == 'RELU':
            use_relu.append(True)
        elif a == 'LINEAR':
            use_relu.append(False)
        else:
            raise ValueError(f'Unknown activation function {act}')
    return tuple(use_relu)


def prepare_params(params):
    """One-time prep: zero-pad to 128 lanes, cast weights to bf16, pack
    bias/gamma/beta into a single (3, Dout_pad) f32 array per layer.

    Call ONCE (e.g. right after init), not per forward step.
    """
    prepared = []
    for p in params:
        din, dout = p['w_t'].shape
        din_p, dout_p = _round_up(din), _round_up(dout)
        w = (jnp.zeros((din_p, dout_p), jnp.float32)
             .at[:din, :dout].set(p['w_t'])
             .astype(jnp.bfloat16))
        vec = jnp.zeros((3, dout_p), jnp.float32)
        vec = vec.at[0, :dout].set(p['b'][0])
        vec = vec.at[1, :dout].set(p['gamma'][0])
        vec = vec.at[2, :dout].set(p['beta'][0])
        prepared.append(dict(w=w, vec=vec,
                             din=din, dout=dout, din_p=din_p, dout_p=dout_p))
    return prepared


def _vmem_limit_bytes(resident_bytes):
    """Derive a VMEM budget from actual resident bytes, clamped to the
    detected generation's physical capacity (v7x-safe fallback)."""
    limit = max(int(resident_bytes) * 2 + (8 << 20), 32 << 20)
    phys = None
    try:
        info = pltpu.get_tpu_info()
        phys = getattr(info, 'vmem_capacity_bytes', None)
    except Exception:
        phys = None
    if not phys:
        phys = 64 << 20          # conservative: v7x per-TensorCore VMEM
    return min(limit, int(phys * 0.85))


def fully_connected_forward(x, prepared, layer_acts, batch_norms, eps=1e-5):
    """Mirrors FullyConnectedModel.forward with one fused Pallas kernel.

    `prepared` must come from prepare_params() (padded bf16 weights +
    packed (3, Dout_pad) vectors) so the hot path does no padding/casting of
    parameters.
    """
    num_layers = len(prepared)
    use_relu = _parse_acts(layer_acts)
    use_bn = tuple(bool(b) for b in batch_norms)

    B, din = x.shape
    din_p = prepared[0]['din_p']
    if din == din_p:
        x_pad = x
    else:
        x_pad = jnp.zeros((B, din_p), jnp.float32).at[:, :din].set(x)

    dout_last = prepared[-1]['dout']
    dout_last_p = prepared[-1]['dout_p']

    kernel = functools.partial(
        _fused_mlp_kernel,
        num_layers=num_layers, use_bn=use_bn, use_relu=use_relu, eps=eps)

    kernel_args = [x_pad]
    for p in prepared:
        kernel_args.extend([p['w'], p['vec']])

    # Cost estimate from TRUE dims (not padded) so XLA scheduling isn't misled.
    cost = pl.CostEstimate(
        flops=int(sum(2 * B * p['din'] * p['dout'] for p in prepared)),
        transcendentals=int(sum(p['dout']
                                for p, bn in zip(prepared, use_bn) if bn)),
        bytes_accessed=int(
            B * din * 4
            + sum(p['din'] * p['dout'] * 2 + 3 * p['dout'] * 4
                  for p in prepared)
            + B * dout_last * 4),
    )

    resident = (x_pad.size * 4
                + sum(p['w'].size * 2 + p['vec'].size * 4 for p in prepared)
                + B * dout_last_p * 4)

    out_pad = pl.pallas_call(
        kernel,
        out_shape=jax.ShapeDtypeStruct((B, dout_last_p), jnp.float32),
        in_specs=[pl.BlockSpec(memory_space=pltpu.VMEM)] * len(kernel_args),
        out_specs=pl.BlockSpec(memory_space=pltpu.VMEM),
        compiler_params=pltpu.CompilerParams(
            vmem_limit_bytes=_vmem_limit_bytes(resident)),
        cost_estimate=cost,
    )(*kernel_args)

    if dout_last == dout_last_p:
        return out_pad                       # already lane-dense; no extra slice
    return out_pad[:, :dout_last]


def init_fully_connected(key, input_dim, layer_dims, batch_norms):
    """Deterministic parameter init (nn.Linear-style uniform bounds)."""
    params = []
    d_in = input_dim
    for d_out, _bn in zip(layer_dims, batch_norms):
        key, kw, kb = jax.random.split(key, 3)
        bound = 1.0 / jnp.sqrt(d_in)
        # PyTorch nn.Linear weight is (out, in); store pre-transposed (in, out).
        w_t = jax.random.uniform(kw, (d_in, d_out), jnp.float32, -bound, bound)
        b = jax.random.uniform(kb, (1, d_out), jnp.float32, -bound, bound)
        gamma = jnp.ones((1, d_out), jnp.float32)   # BatchNorm1d default init
        beta = jnp.zeros((1, d_out), jnp.float32)
        params.append(dict(w_t=w_t, b=b, gamma=gamma, beta=beta))
        d_in = d_out
    return params


def _reference_forward(x, params, layer_acts, batch_norms, eps=1e-5):
    """Pure-JAX reference with PyTorch semantics and matching numerics
    (bf16 matmul operands / f32 accumulation and epilogue, two-pass var)."""
    act = x
    for p, a, bn in zip(params, layer_acts, batch_norms):
        y = jnp.dot(act.astype(jnp.bfloat16), p['w_t'].astype(jnp.bfloat16),
                    preferred_element_type=jnp.float32) + p['b']
        if bn:
            n = y.shape[0]
            mean = jnp.sum(y, axis=0, keepdims=True) / n
            c = y - mean
            var = jnp.sum(c * c, axis=0, keepdims=True) / n
            y = c * jax.lax.rsqrt(var + eps) * p['gamma'] + p['beta']
        if a.upper() == 'RELU':
            y = jnp.maximum(y, 0.0)
        act = y
    return act


if __name__ == "__main__":
    key = jax.random.PRNGKey(0)

    # Small synthetic configuration consistent with the module's __init__.
    batch = 8
    input_dim = 32
    layer_dims = [64, 32, 16]
    layer_acts = ['relu', 'relu', 'linear']
    batch_norms = [True, True, False]

    key, kx, kp = jax.random.split(key, 3)
    x = jax.random.normal(kx, (batch, input_dim), dtype=jnp.float32)
    params = init_fully_connected(kp, input_dim, layer_dims, batch_norms)

    # One-time padding / bf16 cast of parameters (hoisted out of the hot path).
    prepared = prepare_params(params)

    out = fully_connected_forward(x, prepared, layer_acts, batch_norms)
    out = jax.block_until_ready(out)
    assert out.shape == (batch, layer_dims[-1])

    ref = jax.block_until_ready(
        _reference_forward(x, params, layer_acts, batch_norms))
    max_err = float(jnp.max(jnp.abs(out - ref)))
    assert jnp.allclose(out, ref, atol=1e-3, rtol=1e-3), max_err

    print("KERNEL_OK")
</pallas_src>

<mosaic_0001>
module attributes {stable_mosaic.version = 11 : i64} {
  func.func @_fused_mlp_kernel(%arg0: memref<8x128xf32, #tpu.memory_space<vmem>>, %arg1: memref<128x128xbf16, #tpu.memory_space<vmem>>, %arg2: memref<3x128xf32, #tpu.memory_space<vmem>>, %arg3: memref<128x128xbf16, #tpu.memory_space<vmem>>, %arg4: memref<3x128xf32, #tpu.memory_space<vmem>>, %arg5: memref<128x128xbf16, #tpu.memory_space<vmem>>, %arg6: memref<3x128xf32, #tpu.memory_space<vmem>>, %arg7: memref<8x128xf32, #tpu.memory_space<vmem>>) attributes {dimension_semantics = [], scalar_prefetch = 0 : i64, scratch_operands = 0 : i64, tpu.core_type = #tpu.core_type<tc>} {
    %c0 = arith.constant 0 : index
    %c0_0 = arith.constant 0 : index
    %0 = vector.load %arg0[%c0, %c0_0] : memref<8x128xf32, #tpu.memory_space<vmem>>, vector<8x128xf32>
    %1 = arith.truncf %0 : vector<8x128xf32> to vector<8x128xbf16>
    %c0_1 = arith.constant 0 : index
    %c0_2 = arith.constant 0 : index
    %2 = vector.load %arg1[%c0_1, %c0_2] : memref<128x128xbf16, #tpu.memory_space<vmem>>, vector<128x128xbf16>
    %c0_3 = arith.constant 0 : index
    %c0_4 = arith.constant 0 : index
    %3 = vector.load %arg2[%c0_3, %c0_4] : memref<3x128xf32, #tpu.memory_space<vmem>>, vector<3x128xf32>
    %cst = arith.constant dense<0.000000e+00> : vector<8x128xf32>
    %4 = tpu.matmul %1, %2, %cst {dimension_numbers = #tpu.dot_dimension_numbers<[1], [0], [0], [1], [0, 0, 1, 1], [], []>} : vector<8x128xbf16>, vector<128x128xbf16>, vector<8x128xf32> -> vector<8x128xf32>
    %cst_5 = arith.constant dense<0.000000e+00> : vector<128xf32>
    %5 = vector.multi_reduction <add>, %4, %cst_5 [0] : vector<8x128xf32> to vector<128xf32>
    %6 = vector.shape_cast %5 : vector<128xf32> to vector<1x128xf32>
    %cst_6 = arith.constant 1.250000e-01 : f32
    %7 = vector.broadcast %cst_6 : f32 to vector<1x128xf32>
    %8 = arith.mulf %6, %7 : vector<1x128xf32>
    %9 = vector.broadcast %8 : vector<1x128xf32> to vector<8x128xf32>
    %10 = arith.subf %4, %9 : vector<8x128xf32>
    %11 = arith.mulf %10, %10 : vector<8x128xf32>
    %cst_7 = arith.constant dense<0.000000e+00> : vector<128xf32>
    %12 = vector.multi_reduction <add>, %11, %cst_7 [0] : vector<8x128xf32> to vector<128xf32>
    %13 = vector.shape_cast %12 : vector<128xf32> to vector<1x128xf32>
    %cst_8 = arith.constant 1.250000e-01 : f32
    %14 = vector.broadcast %cst_8 : f32 to vector<1x128xf32>
    %15 = arith.mulf %13, %14 : vector<1x128xf32>
    %16 = vector.extract_strided_slice %3 {offsets = [1, 0], sizes = [1, 128], strides = [1, 1]} : vector<3x128xf32> to vector<1x128xf32>
    %17 = vector.extract_strided_slice %3 {offsets = [2, 0], sizes = [1, 128], strides = [1, 1]} : vector<3x128xf32> to vector<1x128xf32>
    %cst_9 = arith.constant 9.99999974E-6 : f32
    %18 = vector.broadcast %cst_9 : f32 to vector<1x128xf32>
    %19 = arith.addf %15, %18 : vector<1x128xf32>
    %20 = math.rsqrt %19 : vector<1x128xf32>
    %21 = arith.mulf %20, %16 : vector<1x128xf32>
    %22 = vector.broadcast %21 : vector<1x128xf32> to vector<8x128xf32>
    %23 = arith.mulf %10, %22 : vector<8x128xf32>
    %24 = vector.broadcast %17 : vector<1x128xf32> to vector<8x128xf32>
    %25 = arith.addf %23, %24 : vector<8x128xf32>
    %cst_10 = arith.constant 0.000000e+00 : f32
    %26 = vector.broadcast %cst_10 : f32 to vector<8x128xf32>
    %27 = arith.maximumf %25, %26 : vector<8x128xf32>
    %28 = arith.truncf %27 : vector<8x128xf32> to vector<8x128xbf16>
    %c0_11 = arith.constant 0 : index
    %c0_12 = arith.constant 0 : index
    %29 = vector.load %arg3[%c0_11, %c0_12] : memref<128x128xbf16, #tpu.memory_space<vmem>>, vector<128x128xbf16>
    %c0_13 = arith.constant 0 : index
    %c0_14 = arith.constant 0 : index
    %30 = vector.load %arg4[%c0_13, %c0_14] : memref<3x128xf32, #tpu.memory_space<vmem>>, vector<3x128xf32>
    %cst_15 = arith.constant dense<0.000000e+00> : vector<8x128xf32>
    %31 = tpu.matmul %28, %29, %cst_15 {dimension_numbers = #tpu.dot_dimension_numbers<[1], [0], [0], [1], [0, 0, 1, 1], [], []>} : vector<8x128xbf16>, vector<128x128xbf16>, vector<8x128xf32> -> vector<8x128xf32>
    %cst_16 = arith.constant dense<0.000000e+00> : vector<128xf32>
    %32 = vector.multi_reduction <add>, %31, %cst_16 [0] : vector<8x128xf32> to vector<128xf32>
    %33 = vector.shape_cast %32 : vector<128xf32> to vector<1x128xf32>
    %cst_17 = arith.constant 1.250000e-01 : f32
    %34 = vector.broadcast %cst_17 : f32 to vector<1x128xf32>
    %35 = arith.mulf %33, %34 : vector<1x128xf32>
    %36 = vector.broadcast %35 : vector<1x128xf32> to vector<8x128xf32>
    %37 = arith.subf %31, %36 : vector<8x128xf32>
    %38 = arith.mulf %37, %37 : vector<8x128xf32>
    %cst_18 = arith.constant dense<0.000000e+00> : vector<128xf32>
    %39 = vector.multi_reduction <add>, %38, %cst_18 [0] : vector<8x128xf32> to vector<128xf32>
    %40 = vector.shape_cast %39 : vector<128xf32> to vector<1x128xf32>
    %cst_19 = arith.constant 1.250000e-01 : f32
    %41 = vector.broadcast %cst_19 : f32 to vector<1x128xf32>
    %42 = arith.mulf %40, %41 : vector<1x128xf32>
    %43 = vector.extract_strided_slice %30 {offsets = [1, 0], sizes = [1, 128], strides = [1, 1]} : vector<3x128xf32> to vector<1x128xf32>
    %44 = vector.extract_strided_slice %30 {offsets = [2, 0], sizes = [1, 128], strides = [1, 1]} : vector<3x128xf32> to vector<1x128xf32>
    %cst_20 = arith.constant 9.99999974E-6 : f32
    %45 = vector.broadcast %cst_20 : f32 to vector<1x128xf32>
    %46 = arith.addf %42, %45 : vector<1x128xf32>
    %47 = math.rsqrt %46 : vector<1x128xf32>
    %48 = arith.mulf %47, %43 : vector<1x128xf32>
    %49 = vector.broadcast %48 : vector<1x128xf32> to vector<8x128xf32>
    %50 = arith.mulf %37, %49 : vector<8x128xf32>
    %51 = vector.broadcast %44 : vector<1x128xf32> to vector<8x128xf32>
    %52 = arith.addf %50, %51 : vector<8x128xf32>
    %cst_21 = arith.constant 0.000000e+00 : f32
    %53 = vector.broadcast %cst_21 : f32 to vector<8x128xf32>
    %54 = arith.maximumf %52, %53 : vector<8x128xf32>
    %55 = arith.truncf %54 : vector<8x128xf32> to vector<8x128xbf16>
    %c0_22 = arith.constant 0 : index
    %c0_23 = arith.constant 0 : index
    %56 = vector.load %arg5[%c0_22, %c0_23] : memref<128x128xbf16, #tpu.memory_space<vmem>>, vector<128x128xbf16>
    %c0_24 = arith.constant 0 : index
    %c0_25 = arith.constant 0 : index
    %57 = vector.load %arg6[%c0_24, %c0_25] : memref<3x128xf32, #tpu.memory_space<vmem>>, vector<3x128xf32>
    %cst_26 = arith.constant dense<0.000000e+00> : vector<8x128xf32>
    %58 = tpu.matmul %55, %56, %cst_26 {dimension_numbers = #tpu.dot_dimension_numbers<[1], [0], [0], [1], [0, 0, 1, 1], [], []>} : vector<8x128xbf16>, vector<128x128xbf16>, vector<8x128xf32> -> vector<8x128xf32>
    %59 = vector.extract_strided_slice %57 {offsets = [0, 0], sizes = [1, 128], strides = [1, 1]} : vector<3x128xf32> to vector<1x128xf32>
    %60 = vector.broadcast %59 : vector<1x128xf32> to vector<8x128xf32>
    %61 = arith.addf %58, %60 : vector<8x128xf32>
    %c0_27 = arith.constant 0 : index
    %c0_28 = arith.constant 0 : index
    %62 = vector.load %arg7[%c0_27, %c0_28] : memref<8x128xf32, #tpu.memory_space<vmem>>, vector<8x128xf32>
    tpu.vector_store %arg7[%c0_27, %c0_28], %61 {strides = array<i32>} : memref<8x128xf32, #tpu.memory_space<vmem>>, vector<8x128xf32>,
    return
  }
}

</mosaic_0001>

<bundles_post_ra>
// kernel: tpu_custom_call.1
= control target key start
LH: loop header
LB: loop body
LE: loop exit
PB: predicated region body
PF: predicated region fallthrough
CT: control target
= control target key end

     0   :  { %12 = vsyncpa [#allocation3], 0  ;;  %s834_s0 = inlined_call_operand.hbm [shape: f32[8,128], index: 0, kind: input, shape index: {}]   ;;  %s835_s1 = inlined_call_operand.hbm [shape: bf16[128,128], index: 1, kind: input, shape index: {}]   ;;  %s836_s2 = inlined_call_operand.hbm [shape: f32[3,128], index: 2, kind: input, shape index: {}]   ;;  %s837_s3 = inlined_call_operand.hbm [shape: bf16[128,128], index: 3, kind: input, shape index: {}]   ;;  %s838_s4 = inlined_call_operand.hbm [shape: f32[3,128], index: 4, kind: input, shape index: {}]   ;;  %s839_s5 = inlined_call_operand.hbm [shape: bf16[128,128], index: 5, kind: input, shape index: {}]   ;;  %s840_s6 = inlined_call_operand.vmem [shape: f32[3,128], index: 6, kind: input, shape index: {}]   ;;  %s841_s7 = inlined_call_operand.hbm [shape: f32[8,128], index: 7, kind: output, shape index: {}]  }
   0x1   :  { %13 = vsyncpa [#allocation6], 0 }
   0x2   :  { %14 = vsyncpa [#allocation9], 0 }
   0x3   :  { %15 = vsyncpa [#allocation12], 0  ;;  %s32_s26 = sshll.u32 %s835_s1, 4  ;;  %s33_s26 = int_to_ptr.hbm [resolvable:$true] %s32_s26 }
   0x4   :  { %16 = vsyncpa [#allocation4], 0  ;;  %s752_s27 = smov [#allocation5]   ;;  %s56_s8 = sshll.u32 %s837_s3, 4  ;;  %s57_s8 = int_to_ptr.hbm [resolvable:$true] %s56_s8 }
   0x5   :  { %s34_s28 = sshll.u32 %s752_s27, 4  ;;  %s753_s9 = smov 64   ;;  %s35_s28 = int_to_ptr.vmem [resolvable:$true] %s34_s28 }
   0x6   :  { %s754_s10 = smov 4   ;;  %s755_s11 = smov [#allocation8]  }
   0x7   :  { %40 = dma.hbm_to_vmem [thread:$0]  %s33_s26, 1024, %s35_s28, [#allocation6], %s753_s9, %s753_s9, %s754_s10  }
   0x8   :  { %s58_s12 = sshll.u32 %s755_s11, 4  ;;  %s22_s14 = sshll.u32 %s834_s0, 4  ;;  %s59_s12 = int_to_ptr.vmem [resolvable:$true] %s58_s12  ;;  %s23_s14 = int_to_ptr.hbm [resolvable:$true] %s22_s14 }
   0x9   :  { %64 = dma.hbm_to_vmem [thread:$0]  %s57_s8, 1024, %s59_s12, [#allocation9], %s753_s9, %s753_s9, %s754_s10  }
   0xa   :  { %s46_s16 = sshll.u32 %s836_s2, 4  ;;  %s756_s17 = smov [#allocation2]   ;;  %s47_s16 = int_to_ptr.hbm [resolvable:$true] %s46_s16 }
   0xb   :  { %s24_s18 = sshll.u32 %s756_s17, 4  ;;  %s757_s19 = smov [#allocation7]   ;;  %s25_s18 = int_to_ptr.vmem [resolvable:$true] %s24_s18 }
   0xc   :  { %27 = dma.hbm_to_vmem [thread:$0]  %s23_s14, 128, %s25_s18, [#allocation3]  }
   0xd   :  { %s48_s20 = sshll.u32 %s757_s19, 4  ;;  %s70_s0 = sshll.u32 %s838_s4, 4  ;;  %s49_s20 = int_to_ptr.vmem [resolvable:$true] %s48_s20  ;;  %s71_s0 = int_to_ptr.hbm [resolvable:$true] %s70_s0 }
   0xe   :  { %51 = dma.hbm_to_vmem [thread:$0]  %s47_s16, 64, %s49_s20, [#allocation6]  }
   0xf   :  { %s80_s25 = sshll.u32 %s839_s5, 4  ;;  %s758_s26 = smov [#allocation10]   ;;  %s81_s25 = int_to_ptr.hbm [resolvable:$true] %s80_s25 }
  0x10   :  { %s72_s2 = sshll.u32 %s758_s26, 4  ;;  %s759_s27 = smov [#allocation11]   ;;  %s73_s2 = int_to_ptr.vmem [resolvable:$true] %s72_s2 }
  0x11   :  { %75 = dma.hbm_to_vmem [thread:$0]  %s71_s0, 64, %s73_s2, [#allocation9]  }
  0x12   :  { %s82_s28 = sshll.u32 %s759_s27, 4  ;;  %s83_s28 = int_to_ptr.vmem [resolvable:$true] %s82_s28 }
  0x13   :  { %88 = dma.hbm_to_vmem [thread:$0]  %s81_s25, 1024, %s83_s28, [#allocation12], %s753_s9, %s753_s9, %s754_s10  }
  0x14   :  { %742 = dma.done.wait [#allocation3], 128  }
  0x15   :  { %743 = vsyncadd [#allocation3], 4294967168 }
  0x16   :  { %744 = dma.done.wait [#allocation6], 1088  }
  0x17   :  { %745 = vsyncadd [#allocation6], 4294966208 }
  0x18   :  { %746 = dma.done.wait [#allocation9], 1088  }
  0x19   :  { %747 = vsyncadd [#allocation9], 4294966208 }
  0x1a   :  { %748 = dma.done.wait [#allocation12], 1024  }
  0x1b   :  { %749 = vsyncadd [#allocation12], 4294966272  ;;  %v544_v0 = vld [vmem:[#allocation5 + $0x38] sm:$0xff]  ;;  %v543_v1 = vld [vmem:[#allocation5 + $0x30] sm:$0xff]  ;;  %s760_s29 = smov [#allocation13]   ;;  %s428_s10 = sshll.u32 %s841_s7, 4  ;;  %s429_s10 = int_to_ptr.hbm [resolvable:$true] %s428_s10 }
  0x1c   :  { %182 = vmatpush.bf16.msra.mxu0 %v544_v0  ;;  %v542_v2 = vld [vmem:[#allocation5 + $0x28] sm:$0xff]  ;;  %v541_v3 = vld [vmem:[#allocation5 + $0x20] sm:$0xff]  ;;  %v540_v4 = vld [vmem:[#allocation5 + $0x18] sm:$0xff]  ;;  %s426_s30 = sshll.u32 %s760_s29, 4  ;;  %s427_s30 = int_to_ptr.vmem [resolvable:$true] %s426_s30 }
  0x1d   :  { %v539_v5 = vld [vmem:[#allocation5 + $0x10] sm:$0xff]  ;;  %v538_v6 = vld [vmem:[#allocation5 + $0x8] sm:$0xff]  ;;  %v537_v7 = vld [vmem:[#allocation5] sm:$0xff] }
  0x1e   :  { %v115_v8 = vld [vmem:[#allocation2] sm:$0xff]  ;;  %v550_v16 = vld [vmem:[#allocation8 + $0x28] sm:$0xff]  ;;  %v549_v20 = vld [vmem:[#allocation8 + $0x20] sm:$0xff] }
  0x1f   :  { %v116_v9 = vpack.c.bf16 %v115_v8, %v115_v8  ;;  %v552_v11 = vld [vmem:[#allocation8 + $0x38] sm:$0xff]  ;;  %v551_v14 = vld [vmem:[#allocation8 + $0x30] sm:$0xff]  ;;  %v546_v29 = vld [vmem:[#allocation8 + $0x8] sm:$0xff] }
  0x20   :  { %183 = vmatpush.bf16.msra.mxu0 %v543_v1  ;;  %294 = vmatpush.bf16.msra.mxu1 %v552_v11  ;;  %v548_v23 = vld [vmem:[#allocation8 + $0x18] sm:$0xff]  ;;  %v547_v26 = vld [vmem:[#allocation8 + $0x10] sm:$0xff]  ;;  %v545_v32 = vld [vmem:[#allocation8] sm:$0xff] }
  0x21   :  { %v133_v42 = vld [vmem:[#allocation7] sm:$0x7]  ;;  %v559_v56 = vld [vmem:[#allocation11 + $0x30] sm:$0xff]  ;;  %v558_v58 = vld [vmem:[#allocation11 + $0x28] sm:$0xff] }
  0x22   :  { %v225_v47 = vperm.slane %v133_v42, 2  ;;  %v560_v53 = vld [vmem:[#allocation11 + $0x38] sm:$0xff]  ;;  %v557_v62 = vld [vmem:[#allocation11 + $0x20] sm:$0xff] }
  0x23   :  { %407 = vmatpush.bf16.msra.mxu2 %v560_v53  ;;  %v556_v1 = vld [vmem:[#allocation11 + $0x18] sm:$0xff] }
  0x24   :  { %184 = vmatpush.bf16.msra.mxu0 %v542_v2  ;;  %295 = vmatpush.bf16.msra.mxu1 %v551_v14 }
  0x27   :  { %408 = vmatpush.bf16.msra.mxu2 %v559_v56 }
  0x28   :  { %185 = vmatpush.bf16.msra.mxu0 %v541_v3  ;;  %296 = vmatpush.bf16.msra.mxu1 %v550_v16 }
  0x2b   :  { %409 = vmatpush.bf16.msra.mxu2 %v558_v58 }
  0x2c   :  { %186 = vmatpush.bf16.msra.mxu0 %v540_v4  ;;  %297 = vmatpush.bf16.msra.mxu1 %v549_v20  ;;  %v555_v4 = vld [vmem:[#allocation11 + $0x10] sm:$0xff]  ;;  %v245_v20 = vld [vmem:[#allocation10] sm:$0x7] }
  0x2f   :  { %410 = vmatpush.bf16.msra.mxu2 %v557_v62 }
  0x30   :  { %187 = vmatpush.bf16.msra.mxu0 %v539_v5  ;;  %298 = vmatpush.bf16.msra.mxu1 %v548_v23 }
  0x33   :  { %411 = vmatpush.bf16.msra.mxu2 %v556_v1 }
  0x34   :  { %188 = vmatpush.bf16.msra.mxu0 %v538_v6  ;;  %299 = vmatpush.bf16.msra.mxu1 %v547_v26 }
  0x37   :  { %412 = vmatpush.bf16.msra.mxu2 %v555_v4 }
  0x38   :  { %189 = vmatpush.bf16.msra.mxu0 %v537_v7  ;;  %300 = vmatpush.bf16.msra.mxu1 %v546_v29  ;;  %v554_v7 = vld [vmem:[#allocation11 + $0x8] sm:$0xff] }
  0x3b   :  { %190 = vmatmul.bf16.vlgmr.msra.gmra.mxu0 %v116_v9  ;;  %413 = vmatpush.bf16.msra.mxu2 %v554_v7 }
  0x3c   :  { %301 = vmatpush.bf16.msra.mxu1 %v545_v32 }
  0xb8   :  { %v191_v10 = vpop.f32.mrf.mxu0 }
  0xb9   :  { %v195_v12 = vrot.slane %v191_v10, 4 }
  0xbb   :  { %v196_v13 = vadd.f32 %v195_v12, %v191_v10 }
  0xbd   :  { %v197_v15 = vrot.slane %v196_v13, 2 }
  0xbf   :  { %v198_v17 = vadd.f32 %v197_v15, %v196_v13 }
  0xc0   :  { %v193_v18 = vpop.f32.mrf.mxu0 }
  0xc1   :  { %v199_v19 = vrot.slane %v198_v17, 1 }
  0xc3   :  { %v200_v21 = vadd.f32 %v199_v19, %v198_v17 }
  0xc5   :  { %v201_v22 = vmul.f32 0.125, %v200_v21 }
  0xc7   :  { %v202_v24 = vsub.f32 %v191_v10, %v201_v22  ;;  %v553_v10 = vld [vmem:[#allocation11] sm:$0xff] }
  0xc8   :  { %414 = vmatpush.bf16.msra.mxu2 %v553_v10 }
  0xc9   :  { %v203_v25 = vmul.f32 %v202_v24, %v202_v24 }
  0xcb   :  { %v204_v27 = vrot.slane %v203_v25, 4 }
  0xcd   :  { %v205_v28 = vadd.f32 %v204_v27, %v203_v25  ;;  %v337_v25 = vperm.slane %v245_v20, 2 }
  0xcf   :  { %v206_v30 = vrot.slane %v205_v28, 2 }
  0xd1   :  { %v207_v31 = vadd.f32 %v206_v30, %v205_v28  ;;  %v357_v30 = vld [vmem:[%s840_s6] sm:$0x7] }
  0xd3   :  { %v208_v33 = vrot.slane %v207_v31, 1 }
  0xd5   :  { %v209_v34 = vadd.f32 %v208_v33, %v207_v31  ;;  %v358_v31 = vperm.slane %v357_v30, 0 }
  0xd7   :  { %v210_v35 = vmul.f32 0.125, %v209_v34 }
  0xd9   :  { %v211_v36 = vadd.f32 1e-05, %v210_v35 }
  0xdb   :  { %570 = vrsqrt.f32 %v211_v36  ;;  %vm218_vm1 = vweird.f32 %v211_v36 }
  0xe1   :  { %v571_v37 = vpop.eup %570 }
  0xe2   :  { %v213_v38 = vmul.f32 %v571_v37, %v211_v36  ;;  %vm219_vm0 = vweird.f32 %v571_v37 }
  0xe3   :  { %vm220_vm2 = vmor %vm218_vm1, %vm219_vm0 }
  0xe4   :  { %v214_v39 = vmul.f32 %v571_v37, %v213_v38 }
  0xe6   :  { %v215_v40 = vmul.f32 0.5, %v214_v39 }
  0xe8   :  { %v216_v41 = vsub.f32 1.5, %v215_v40 }
  0xea   :  { %v217_v43 = vmul.f32 %v571_v37, %v216_v41 }
  0xec   :  { %v221_v44 = vsel %vm220_vm2, %v571_v37, %v217_v43 }
  0xed   :  { %v222_v45 = vmul.f32 %v221_v44, %v133_v42 }
  0xef   :  { %v223_v46 = vperm.slane %v222_v45, 1 }
  0xf1   :  { %v224_v48 = vmul.f32 %v223_v46, %v202_v24 }
  0xf3   :  { %v226_v49 = vadd.f32 %v225_v47, %v224_v48 }
  0xf5   :  { %v227_v50 = vmax.f32 %v226_v49, 0.0 }
  0xf7   :  { %v228_v51 = vpack.c.bf16 %v227_v50, %v227_v50 }
  0xf9   :  { %302 = vmatmul.bf16.vlgmr.msra.gmra.mxu1 %v228_v51 }
 0x176   :  { %v303_v52 = vpop.f32.mrf.mxu1 }
 0x177   :  { %v307_v54 = vrot.slane %v303_v52, 4 }
 0x179   :  { %v308_v55 = vadd.f32 %v307_v54, %v303_v52 }
 0x17b   :  { %v309_v57 = vrot.slane %v308_v55, 2 }
 0x17d   :  { %v310_v59 = vadd.f32 %v309_v57, %v308_v55 }
 0x17e   :  { %v305_v60 = vpop.f32.mrf.mxu1 }
 0x17f   :  { %v311_v61 = vrot.slane %v310_v59, 1 }
 0x181   :  { %v312_v63 = vadd.f32 %v311_v61, %v310_v59 }
 0x183   :  { %v313_v0 = vmul.f32 0.125, %v312_v63 }
 0x185   :  { %v314_v2 = vsub.f32 %v303_v52, %v313_v0 }
 0x187   :  { %v315_v3 = vmul.f32 %v314_v2, %v314_v2 }
 0x189   :  { %v316_v5 = vrot.slane %v315_v3, 4 }
 0x18b   :  { %v317_v6 = vadd.f32 %v316_v5, %v315_v3 }
 0x18d   :  { %v318_v8 = vrot.slane %v317_v6, 2 }
 0x18f   :  { %v319_v9 = vadd.f32 %v318_v8, %v317_v6 }
 0x191   :  { %v320_v11 = vrot.slane %v319_v9, 1 }
 0x193   :  { %v321_v12 = vadd.f32 %v320_v11, %v319_v9 }
 0x195   :  { %v322_v13 = vmul.f32 0.125, %v321_v12 }
 0x197   :  { %v323_v14 = vadd.f32 1e-05, %v322_v13 }
 0x199   :  { %572 = vrsqrt.f32 %v323_v14  ;;  %vm330_vm4 = vweird.f32 %v323_v14 }
 0x19f   :  { %v573_v15 = vpop.eup %572 }
 0x1a0   :  { %v325_v16 = vmul.f32 %v573_v15, %v323_v14  ;;  %vm331_vm3 = vweird.f32 %v573_v15 }
 0x1a1   :  { %vm332_vm5 = vmor %vm330_vm4, %vm331_vm3 }
 0x1a2   :  { %v326_v17 = vmul.f32 %v573_v15, %v325_v16 }
 0x1a4   :  { %v327_v18 = vmul.f32 0.5, %v326_v17 }
 0x1a6   :  { %v328_v19 = vsub.f32 1.5, %v327_v18 }
 0x1a8   :  { %v329_v21 = vmul.f32 %v573_v15, %v328_v19 }
 0x1aa   :  { %v333_v22 = vsel %vm332_vm5, %v573_v15, %v329_v21 }
 0x1ab   :  { %v334_v23 = vmul.f32 %v333_v22, %v245_v20 }
 0x1ad   :  { %v335_v24 = vperm.slane %v334_v23, 1 }
 0x1af   :  { %v336_v26 = vmul.f32 %v335_v24, %v314_v2 }
 0x1b1   :  { %v338_v27 = vadd.f32 %v337_v25, %v336_v26 }
 0x1b3   :  { %v339_v28 = vmax.f32 %v338_v27, 0.0 }
 0x1b5   :  { %v340_v29 = vpack.c.bf16 %v339_v28, %v339_v28 }
 0x1b7   :  { %415 = vmatmul.bf16.vlgmr.msra.gmra.mxu2 %v340_v29 }
 0x23a   :  { %v416_v32 = vpop.f32.mrf.mxu2 }
 0x23b   :  { %v417_v33 = vadd.f32 %v416_v32, %v358_v31 }
 0x23d   :  { %420 = vst [vmem:[#allocation13] sm:$0xff] %v417_v33 }
 0x23e   :  { %431 = dma.vmem_to_hbm [thread:$0]  %s427_s30, 128, %s429_s10, [#allocation4]  }
 0x242   :  { %v418_v34 = vpop.f32.mrf.mxu2 }
 0x243   :  { %750 = dma.done.wait [#allocation4], 128  }
 0x244   :  { %751 = vsyncadd [#allocation4], 4294967168 }
 0x245   :  { %436 = vsyncpa [#allocation3], 1 }
 0x246   :  { %437 = vsyncpa [#allocation6], 1 }
 0x247   :  { %438 = vsyncpa [#allocation9], 1 }
 0x248   :  { %439 = vsyncpa [#allocation12], 1 }
 0x249   :  { %440 = vsyncpa [#allocation4], 1 }

</bundles_post_ra>
